<compile_context>
chip_gen: v7x
topology: tpu7x:2x2x1
jax: 0.10.0
libtpu: 0.0.40
codegen_flags: <defaults>
</compile_context>

<pallas_src>
import functools

import jax
import jax.numpy as jnp
from jax.experimental import pallas as pl
from jax.experimental.pallas import tpu as pltpu

NUM_CLASSES = 56
IGNORE_INDEX = -100  # PyTorch nn.CrossEntropyLoss default


def _ce_kernel(logits_ref, labels_ref, out_ref, acc_ref, *,
               num_blocks, tiles_per_core, group, num_classes):
    p = pl.program_id(0)   # parallel partition (one per TensorCore on v7x)
    t = pl.program_id(1)   # reduction axis over row tiles (carries accumulator)

    @pl.when(t == 0)
    def _init():
        acc_ref[...] = jnp.zeros_like(acc_ref)

    blk = p * tiles_per_core + t

    # Skip compute entirely for the (at most one) duplicate clamped block of
    # an over-provisioned partition; its DMA re-reads a real block, harmless.
    @pl.when(blk < num_blocks)
    def _accumulate():
        x = logits_ref[...].astype(jnp.float32)        # (tile_n, C)
        lbl = labels_ref[...]                          # (tile_n, 1) int32

        # Numerically-stable log-softmax pieces.
        m = jnp.max(x, axis=-1, keepdims=True)         # (tile_n, 1)   XLU
        z = x - m                                      #               VPU
        e = jnp.exp(z)                                 #               EUP

        # Sum of true-class logits:  sum_r z[r, y_r].
        # One-hot is automatically all-false for ignore_index / padded rows
        # (label -100 never matches a class), so no extra validity mask is
        # needed here.  The reduction is a cheap cross-vreg VPU tree-sum.
        col = jax.lax.broadcasted_iota(jnp.int32, (1, num_classes), 1)
        onehot = col == lbl                            # (tile_n, C)   VPU
        zsel = jnp.where(onehot, z, 0.0)               #               VPU
        zsel_sum = jnp.sum(jnp.sum(zsel, axis=0, keepdims=True),
                           axis=1, keepdims=True)      # (1, 1)

        # Row softmax denominators; ignored / padded rows forced to 1 so they
        # contribute log(1)=0 (also kills NaN/Inf from garbage padding rows).
        s = jnp.sum(e, axis=-1, keepdims=True)         # (tile_n, 1)   XLU
        valid = lbl != IGNORE_INDEX
        s = jnp.where(valid, s, 1.0)

        # Grouped-product trick:  sum_r log(s_r) = sum_j log(prod_g s[g*chunk+j]).
        # s in [1, 56] and group <= 16  =>  product <= 56**16 < f32 max, and the
        # accumulated rounding error is ~1e-6.  The products are plain VPU
        # multiplies between whole vregs; the log then touches group-x fewer
        # vregs than a direct per-row log.
        tile_n = s.shape[0]
        chunk = tile_n // group
        prod = s[0:chunk]
        for g in range(1, group):
            prod = prod * s[g * chunk:(g + 1) * chunk]
        lse_sum = jnp.sum(jnp.log(prod), axis=0, keepdims=True)   # (1, 1)

        # sum over valid rows of (logsumexp(x_r) - x[r, y_r])
        acc_ref[...] += lse_sum - zsel_sum

    @pl.when(t == tiles_per_core - 1)
    def _finalize():
        out_ref[...] = acc_ref[...]


def cross_entropy_loss(logits, label, *, tile_rows=4096):
    """Matches nn.CrossEntropyLoss()(logits.view(-1, 56), label.view(-1))."""
    # No wrapper dtype cast: bf16 logits stream at half the HBM cost and are
    # up-cast inside the kernel.
    logits2d = jnp.reshape(logits, (-1, NUM_CLASSES))
    labels1d = jnp.reshape(label, (-1,)).astype(jnp.int32)
    n = logits2d.shape[0]

    # reduction='mean' denominator (non-ignored targets): trivial XLA op on
    # the tiny label array, exact in int, cast once.
    count = jnp.sum((labels1d != IGNORE_INDEX).astype(jnp.float32))

    if n <= tile_rows:
        tile_n = n                       # full array dim -> no (8,128) issue
    else:
        tile_n = max(8, (tile_rows // 8) * 8)
    num_blocks = pl.cdiv(n, tile_n)

    # Largest group size (<=16) whose chunks stay sublane-aligned.
    group = 1
    for g in (16, 8, 4, 2):
        if tile_n % (8 * g) == 0:
            group = g
            break

    # Pad labels with IGNORE_INDEX up to a whole number of blocks: rows past
    # the true N (partial last tile) are then excluded purely via the label,
    # no per-row index iota/compare needed in the kernel.
    padded_n = num_blocks * tile_n
    labels_col = jnp.pad(labels1d, (0, padded_n - n),
                         constant_values=IGNORE_INDEX).reshape(padded_n, 1)

    # Leading "parallel" axis: 2 partial loss sums so v7x's two TensorCores
    # split the row tiles; single-TC chips just loop over it.
    num_parallel = 2 if num_blocks >= 2 else 1
    tiles_per_core = pl.cdiv(num_blocks, num_parallel)

    def in_map(p_, t_):
        # Clamp so an over-provisioned last partition never indexes a block
        # past the array; that duplicate block's compute is pl.when-gated.
        return (jnp.minimum(p_ * tiles_per_core + t_, num_blocks - 1), 0)

    kernel = functools.partial(
        _ce_kernel, num_blocks=num_blocks, tiles_per_core=tiles_per_core,
        group=group, num_classes=NUM_CLASSES)

    loss_parts = pl.pallas_call(
        kernel,
        out_shape=jax.ShapeDtypeStruct((num_parallel, 1), jnp.float32),
        grid_spec=pltpu.PrefetchScalarGridSpec(
            num_scalar_prefetch=0,
            grid=(num_parallel, tiles_per_core),
            in_specs=[
                pl.BlockSpec((tile_n, NUM_CLASSES), in_map),
                pl.BlockSpec((tile_n, 1), in_map),
            ],
            out_specs=pl.BlockSpec((1, 1), lambda p_, t_: (p_, 0)),
            scratch_shapes=[pltpu.VMEM((1, 1), jnp.float32)],
        ),
        compiler_params=pltpu.CompilerParams(
            dimension_semantics=("parallel", "arbitrary"),
            vmem_limit_bytes=48 * 1024 * 1024,
        ),
    )(logits2d, labels_col)

    return jnp.sum(loss_parts) / count


if __name__ == "__main__":
    key = jax.random.PRNGKey(0)
    k1, k2, k3, k4 = jax.random.split(key, 4)

    # --- Test 1: small shapes matching the module (single tile path) ---
    batch, seq = 2, 4
    logits = jax.random.normal(k1, (batch, seq, NUM_CLASSES), dtype=jnp.float32)
    label = jax.random.randint(k2, (batch, seq), 0, NUM_CLASSES, dtype=jnp.int32)

    loss = cross_entropy_loss(logits, label)
    jax.block_until_ready(loss)

    x = logits.reshape(-1, NUM_CLASSES)
    y = label.reshape(-1)
    logp = jax.nn.log_softmax(x, axis=-1)
    ref = -jnp.mean(logp[jnp.arange(x.shape[0]), y])
    assert jnp.allclose(loss, ref, atol=1e-4, rtol=1e-4), (loss, ref)

    # --- Test 2: exercise multi-tile grid (odd block count), 2-way partials,
    #             duplicate-block gating, padded-row masking, grouped product
    #             and ignore_index=-100, with a tiny tile size ---
    b2, s2 = 3, 37                       # N = 111 (not a multiple of the tile)
    logits2 = jax.random.normal(k3, (b2, s2, NUM_CLASSES), dtype=jnp.float32)
    label2 = jax.random.randint(k4, (b2, s2), 0, NUM_CLASSES, dtype=jnp.int32)
    label2 = label2.at[0, 0].set(IGNORE_INDEX).at[2, 5].set(IGNORE_INDEX)

    loss2 = cross_entropy_loss(logits2, label2, tile_rows=16)
    jax.block_until_ready(loss2)

    x2 = logits2.reshape(-1, NUM_CLASSES)
    y2 = label2.reshape(-1)
    keep = y2 != IGNORE_INDEX
    logp2 = jax.nn.log_softmax(x2, axis=-1)
    picked = jnp.take_along_axis(logp2, jnp.where(keep, y2, 0)[:, None],
                                 axis=-1)[:, 0]
    ref2 = -jnp.sum(jnp.where(keep, picked, 0.0)) / jnp.sum(keep)
    assert jnp.allclose(loss2, ref2, atol=1e-4, rtol=1e-4), (loss2, ref2)

    print("KERNEL_OK")
</pallas_src>

<mosaic_0001>
module attributes {stable_mosaic.version = 11 : i64} {
  func.func @_ce_kernel(%arg0: i32, %arg1: i32, %arg2: memref<8x56xf32, #tpu.memory_space<vmem>>, %arg3: memref<8x1xi32, #tpu.memory_space<vmem>>, %arg4: memref<1x1xf32, #tpu.memory_space<vmem>>, %arg5: memref<1x1xf32, #tpu.memory_space<vmem>>) attributes {dimension_semantics = [#tpu.dimension_semantics<parallel>, #tpu.dimension_semantics<arbitrary>], iteration_bounds = array<i64: 1, 1>, scalar_prefetch = 0 : i64, scratch_operands = 1 : i64, tpu.core_type = #tpu.core_type<tc>, window_params = [{transform_indices = @transform_0, window_bounds = array<i64: 8, 56>}, {transform_indices = @transform_1, window_bounds = array<i64: 8, 1>}, {transform_indices = @transform_2, window_bounds = array<i64: 1, 1>}]} {
    %c0_i32 = arith.constant 0 : i32
    %0 = arith.cmpi eq, %arg1, %c0_i32 : i32
    %1 = arith.extui %0 : i1 to i32
    %c0_i32_0 = arith.constant 0 : i32
    %2 = arith.cmpi ne, %1, %c0_i32_0 : i32
    scf.if %2 {
      %cst = arith.constant 0.000000e+00 : f32
      %11 = vector.broadcast %cst : f32 to vector<1x1xf32>
      %c0 = arith.constant 0 : index
      %c0_5 = arith.constant 0 : index
      %12 = vector.load %arg5[%c0, %c0_5] : memref<1x1xf32, #tpu.memory_space<vmem>>, vector<1x1xf32>
      tpu.vector_store %arg5[%c0, %c0_5], %11 {strides = array<i32>} : memref<1x1xf32, #tpu.memory_space<vmem>>, vector<1x1xf32>,
    } else {
    }
    %c1_i32 = arith.constant 1 : i32
    %3 = arith.muli %arg0, %c1_i32 : i32
    %4 = arith.addi %3, %arg1 : i32
    %c1_i32_1 = arith.constant 1 : i32
    %5 = arith.cmpi slt, %4, %c1_i32_1 : i32
    %6 = arith.extui %5 : i1 to i32
    %c0_i32_2 = arith.constant 0 : i32
    %7 = arith.cmpi ne, %6, %c0_i32_2 : i32
    scf.if %7 {
      %c0 = arith.constant 0 : index
      %c0_5 = arith.constant 0 : index
      %11 = vector.load %arg2[%c0, %c0_5] : memref<8x56xf32, #tpu.memory_space<vmem>>, vector<8x56xf32>
      %c0_6 = arith.constant 0 : index
      %c0_7 = arith.constant 0 : index
      %12 = vector.load %arg3[%c0_6, %c0_7] : memref<8x1xi32, #tpu.memory_space<vmem>>, vector<8x1xi32>
      %cst = arith.constant dense<0xFF800000> : vector<8xf32>
      %13 = vector.multi_reduction <maximumf>, %11, %cst [1] : vector<8x56xf32> to vector<8xf32>
      %14 = vector.shape_cast %13 : vector<8xf32> to vector<8x1xf32>
      %15 = vector.broadcast %14 : vector<8x1xf32> to vector<8x56xf32>
      %16 = arith.subf %11, %15 : vector<8x56xf32>
      %17 = math.exp %16 : vector<8x56xf32>
      %18 = tpu.iota {dimensions = array<i32: 1>} : vector<1x56xi32>
      %19 = vector.broadcast %18 : vector<1x56xi32> to vector<8x56xi32>
      %20 = vector.broadcast %12 : vector<8x1xi32> to vector<8x56xi32>
      %21 = arith.cmpi eq, %19, %20 : vector<8x56xi32>
      %cst_8 = arith.constant 0.000000e+00 : f32
      %22 = vector.broadcast %cst_8 : f32 to vector<8x56xf32>
      %23 = arith.select %21, %16, %22 : vector<8x56xi1>, vector<8x56xf32>
      %cst_9 = arith.constant dense<0.000000e+00> : vector<56xf32>
      %24 = vector.multi_reduction <add>, %23, %cst_9 [0] : vector<8x56xf32> to vector<56xf32>
      %25 = vector.shape_cast %24 : vector<56xf32> to vector<1x56xf32>
      %cst_10 = arith.constant dense<0.000000e+00> : vector<1xf32>
      %26 = vector.multi_reduction <add>, %25, %cst_10 [1] : vector<1x56xf32> to vector<1xf32>
      %27 = vector.shape_cast %26 : vector<1xf32> to vector<1x1xf32>
      %cst_11 = arith.constant dense<0.000000e+00> : vector<8xf32>
      %28 = vector.multi_reduction <add>, %17, %cst_11 [1] : vector<8x56xf32> to vector<8xf32>
      %29 = vector.shape_cast %28 : vector<8xf32> to vector<8x1xf32>
      %c-100_i32 = arith.constant -100 : i32
      %30 = vector.broadcast %c-100_i32 : i32 to vector<8x1xi32>
      %31 = arith.cmpi ne, %12, %30 : vector<8x1xi32>
      %cst_12 = arith.constant 1.000000e+00 : f32
      %32 = vector.broadcast %cst_12 : f32 to vector<8x1xf32>
      %33 = arith.select %31, %29, %32 : vector<8x1xi1>, vector<8x1xf32>
      %34 = math.log %33 : vector<8x1xf32>
      %cst_13 = arith.constant dense<0.000000e+00> : vector<1xf32>
      %35 = vector.multi_reduction <add>, %34, %cst_13 [0] : vector<8x1xf32> to vector<1xf32>
      %36 = vector.shape_cast %35 : vector<1xf32> to vector<1x1xf32>
      %c0_14 = arith.constant 0 : index
      %c0_15 = arith.constant 0 : index
      %37 = vector.load %arg5[%c0_14, %c0_15] : memref<1x1xf32, #tpu.memory_space<vmem>>, vector<1x1xf32>
      %38 = arith.subf %36, %27 : vector<1x1xf32>
      %39 = arith.addf %37, %38 : vector<1x1xf32>
      %c0_16 = arith.constant 0 : index
      %c0_17 = arith.constant 0 : index
      %40 = vector.load %arg5[%c0_16, %c0_17] : memref<1x1xf32, #tpu.memory_space<vmem>>, vector<1x1xf32>
      tpu.vector_store %arg5[%c0_16, %c0_17], %39 {strides = array<i32>} : memref<1x1xf32, #tpu.memory_space<vmem>>, vector<1x1xf32>,
    } else {
    }
    %c0_i32_3 = arith.constant 0 : i32
    %8 = arith.cmpi eq, %arg1, %c0_i32_3 : i32
    %9 = arith.extui %8 : i1 to i32
    %c0_i32_4 = arith.constant 0 : i32
    %10 = arith.cmpi ne, %9, %c0_i32_4 : i32
    scf.if %10 {
      %c0 = arith.constant 0 : index
      %c0_5 = arith.constant 0 : index
      %11 = vector.load %arg5[%c0, %c0_5] : memref<1x1xf32, #tpu.memory_space<vmem>>, vector<1x1xf32>
      %c0_6 = arith.constant 0 : index
      %c0_7 = arith.constant 0 : index
      %12 = vector.load %arg4[%c0_6, %c0_7] : memref<1x1xf32, #tpu.memory_space<vmem>>, vector<1x1xf32>
      tpu.vector_store %arg4[%c0_6, %c0_7], %11 {strides = array<i32>} : memref<1x1xf32, #tpu.memory_space<vmem>>, vector<1x1xf32>,
    } else {
    }
    return
  }
  func.func @transform_0(%arg0: i32, %arg1: i32) -> (i32, i32) {
    %c1_i32 = arith.constant 1 : i32
    %0 = arith.muli %arg0, %c1_i32 : i32
    %1 = arith.addi %0, %arg1 : i32
    %c0_i32 = arith.constant 0 : i32
    %2 = arith.minsi %1, %c0_i32 : i32
    %c0_i32_0 = arith.constant 0 : i32
    %c0_i32_1 = arith.constant 0 : i32
    return %2, %c0_i32_0 : i32, i32
  }
  func.func @transform_1(%arg0: i32, %arg1: i32) -> (i32, i32) {
    %c1_i32 = arith.constant 1 : i32
    %0 = arith.muli %arg0, %c1_i32 : i32
    %1 = arith.addi %0, %arg1 : i32
    %c0_i32 = arith.constant 0 : i32
    %2 = arith.minsi %1, %c0_i32 : i32
    %c0_i32_0 = arith.constant 0 : i32
    %c0_i32_1 = arith.constant 0 : i32
    return %2, %c0_i32_0 : i32, i32
  }
  func.func @transform_2(%arg0: i32, %arg1: i32) -> (i32, i32) {
    %c0_i32 = arith.constant 0 : i32
    %c0_i32_0 = arith.constant 0 : i32
    return %arg0, %c0_i32 : i32, i32
  }
}

</mosaic_0001>

<bundles_post_ra>
// kernel: tpu_custom_call.1
= control target key start
LH: loop header
LB: loop body
LE: loop exit
PB: predicated region body
PF: predicated region fallthrough
CT: control target
= control target key end

     0   :  { %vm79_vm0 = vcmask 457728   ;;  %s230_s0 = inlined_call_operand.vmem [shape: f32[8,56], index: 0, kind: input, shape index: {}]   ;;  %s231_s1 = inlined_call_operand.vmem [shape: s32[8,1], index: 1, kind: input, shape index: {}]   ;;  %s232_s2 = inlined_call_operand.hbm [shape: f32[1,1], index: 2, kind: output, shape index: {}]  }
   0x1   :  { %v77_v0 = vld [vmem:[%s230_s0] sm:$0xff] }
   0x2   :  { %7 = vsyncpa [#allocation4], 0  ;;  %v80_v1 = vsel %vm79_vm0, %v77_v0, -inf  ;;  %v187_v2 = vmov 0   ;;  %v78_v3 = vld [vmem:[%s231_s1] sm:$0xff]  ;;  %v86_v6 = vlaneseq  ;;  %vm70_vm2 = vcmask 0  }
   0x3   :  { %158 = vset.pattern.permute.xlu0 %v187_v2  ;;  %v188_v21 = vmov 0.0   ;;  %vm106_vm3 = vcmp.ne.s32.totalorder %v78_v3, 4294967196  ;;  %vm110_vm4 = vcmask 7168   ;;  %s189_s0 = smov [#allocation3]  }
   0x4   :  { %81 = vmax.xlane.f32.xlu0 %v80_v1  ;;  %v87_v8 = vand.u32 127, %v86_v6  ;;  %71 = vst.msk [vmem:[#allocation2] sm:$0x1] %vm70_vm2, %v188_v21  ;;  %s135_s1 = sshll.u32 %s189_s0, 4  ;;  %s136_s1 = int_to_ptr.vmem [resolvable:$true] %s135_s1 }
   0x5   :  { %s163_s13 = scalar_lea.vmem %s136_s1, 16  ;;  %s167_s14 = scalar_lea.vmem %s136_s1, 32 }
   0x6   :  { %p164_p0 = scmp.ne.s32.totalorder %s136_s1, %s163_s13  ;;  %p168_p1 = scmp.lt.s32.totalorder %s136_s1, %s136_s1 }
   0x7   :  { %p169_p2 = scmp.lt.s32.totalorder %s167_s14, %s163_s13 }
   0x9   :  { %p170_p3 = por %p169_p2, %p168_p1 }
   0xb   :  { %v118_v34 = vld [vmem:[#allocation2] sm:$0x1]  ;;  %p171_p4 = pnand %p170_p3, %p164_p0 }
  0x1a   :  { %89 = vperm.xlu0 %158, %v78_v3  }
  0x91   :  { %v82_v4 = vpop.xlane.xlu0 %81 }
  0x92   :  { %v83_v5 = vsub.f32 %v77_v0, %v82_v4 }
  0x94   :  { %v84_v7 = vmul.f32 1.442695, %v83_v5 }
  0x96   :  { %159 = vpow2.f32 %v84_v7 }
  0x99   :  { %v90_v9 = vpop.permute.xlu0 %89 }
  0x9a   :  { %vm91_vm1 = vcmp.eq.s32.totalorder %v87_v8, %v90_v9 }
  0x9b   :  { %v92_v10 = vsel %vm91_vm1, %v83_v5, 0.0 }
  0x9c   :  { %v93_v11 = vsel %vm79_vm0, %v92_v10, 0.0 }
  0x9d   :  { %v94_v12 = vrot.slane %v93_v11, 4 }
  0x9f   :  { %v95_v13 = vadd.f32 %v94_v12, %v93_v11 }
  0xa0   :  { %v160_v14 = vpop.eup %159 }
  0xa1   :  { %v96_v15 = vrot.slane %v95_v13, 2  ;;  %v103_v16 = vsel %vm79_vm0, %v160_v14, 0.0 }
  0xa2   :  { %104 = vadd.xlane.f32.xlu1 %v103_v16 }
  0xa3   :  { %v97_v17 = vadd.f32 %v96_v15, %v95_v13 }
  0xa5   :  { %v98_v18 = vrot.slane %v97_v17, 1 }
  0xa7   :  { %v99_v19 = vadd.f32 %v98_v18, %v97_v17 }
  0xa9   :  { %v100_v20 = vsel %vm79_vm0, %v99_v19, 0.0 }
  0xaa   :  { %101 = vadd.xlane.f32.xlu1 %v100_v20 }
 0x12f   :  { %v105_v22 = vpop.xlane.xlu1 %104 }
 0x130   :  { %v107_v23 = vsel %vm106_vm3, %v105_v22, 1.0 }
 0x131   :  { %161 = vlog2.f32 %v107_v23 }
 0x137   :  { %v102_v33 = vpop.xlane.xlu1 %101 }
 0x13b   :  { %v162_v24 = vpop.eup %161 }
 0x13c   :  { %v109_v25 = vmul.f32 0.6931472, %v162_v24 }
 0x13e   :  { %v111_v26 = vsel %vm110_vm4, %v109_v25, 0.0 }
 0x13f   :  { %v112_v27 = vrot.slane %v111_v26, 4 }
 0x141   :  { %v113_v28 = vadd.f32 %v112_v27, %v111_v26 }
 0x143   :  { %v114_v29 = vrot.slane %v113_v28, 2 }
 0x145   :  { %v115_v30 = vadd.f32 %v114_v29, %v113_v28 }
 0x147   :  { %v116_v31 = vrot.slane %v115_v30, 1 }
 0x149   :  { %v117_v32 = vadd.f32 %v116_v31, %v115_v30 }
 0x14b   :  { %v119_v35 = vsub.f32 %v117_v32, %v102_v33 }
 0x14d   :  { %v120_v36 = vadd.f32 %v119_v35, %v118_v34 }
 0x14f   :  { %122 = vst.msk [vmem:[#allocation2] sm:$0x1] %vm70_vm2, %v120_v36 }
 0x156   :  { %v126_v37 = vld [vmem:[#allocation2] sm:$0x1] }
 0x157   :  { %128 = vst.msk [vmem:[#allocation3] sm:$0x1] %vm70_vm2, %v126_v37 }
 0x158   :  { %174 = shalt.err (!%p171_p4)
}
 0x159   :  { %s175_s17 = scalar_lea.hbm %s232_s2, 16 }
 0x15a   :  { %p176_p5 = scmp.ne.s32.totalorder %s232_s2, %s175_s17  ;;  %p179_p6 = scmp.lt.u32.totalorder %s175_s17, %s232_s2 }
 0x15c   :  { %p181_p7 = pnand %p179_p6, %p176_p5 }
 0x15e   :  { %184 = shalt.err (!%p181_p7)
}
 0x15f   :  { %138 = dma.vmem_to_hbm [thread:$0]  %s136_s1, 16, %s232_s2, [#allocation4]  }
 0x160   :  { %185 = dma.done.wait [#allocation4], 16  }
 0x161   :  { %186 = vsyncadd [#allocation4], 4294967280 }
 0x162   :  { %142 = vsyncpa [#allocation4], 1 }

</bundles_post_ra>
